<compile_context>
chip_gen: v5e
topology: v5e:2x2
jax: 0.10.0
libtpu: 0.0.40
codegen_flags: <defaults>
</compile_context>

<pallas_src>
import jax
import jax.numpy as jnp
from jax.experimental import pallas as pl
from jax.experimental.pallas import tpu as pltpu

H1 = 512
H2 = 256
LN_EPS = 1e-5


def _layernorm(h, gamma, beta):
    # PyTorch nn.LayerNorm: biased variance (divide by N), eps inside sqrt.
    mu = jnp.mean(h, axis=-1, keepdims=True)
    var = jnp.mean((h - mu) * (h - mu), axis=-1, keepdims=True)
    return (h - mu) * jax.lax.rsqrt(var + LN_EPS) * gamma + beta


def norm_mlp_head_kernel(
    x_ref,
    w1_ref, b1_ref, g1_ref, be1_ref,
    w2_ref, b2_ref, g2_ref, be2_ref,
    w3_ref, b3_ref,
    o_ref,
):
    # fc1 (bf16 x bf16 -> f32 acc) -> LayerNorm(512) -> ReLU
    # (dropout1: identity at inference)
    x = x_ref[...].astype(jnp.bfloat16)
    h = jnp.dot(x, w1_ref[...], preferred_element_type=jnp.float32) + b1_ref[...]
    h = _layernorm(h, g1_ref[...], be1_ref[...])
    h = jnp.maximum(h, 0.0)
    # TODO(synk): training-mode dropout (p=0.5) not implemented; eval-mode identity.

    # fc2 (bf16 x bf16 -> f32 acc) -> LayerNorm(256) -> ReLU
    # (dropout2: identity at inference)
    h = jnp.dot(h.astype(jnp.bfloat16), w2_ref[...],
                preferred_element_type=jnp.float32) + b2_ref[...]
    h = _layernorm(h, g2_ref[...], be2_ref[...])
    h = jnp.maximum(h, 0.0)

    # fc3 has a single output column -> keep it off the MXU: VPU broadcast
    # multiply + lane (XLU) reduction, f32 throughout.
    logit = jnp.sum(h * w3_ref[...], axis=-1, keepdims=True) + b3_ref[...]
    o_ref[...] = jax.nn.sigmoid(logit).astype(o_ref.dtype)


def _choose_tile(B, *, tb_max=2048, min_steps=2, max_pad_frac=0.10):
    """Largest sublane-aligned batch tile that (a) leaves >= min_steps grid
    steps (so v7x's two TensorCores both get work) and (b) keeps last-tile
    padding under ~max_pad_frac."""
    B8 = -(-B // 8) * 8                       # round batch up to sublane multiple
    if B8 <= 8 * min_steps:
        return 8                              # tiny batch: one minimal tile
    cap = max(8, min(tb_max, (B8 // min_steps) // 8 * 8))
    for tb in range(cap, 7, -8):
        Bp = -(-B8 // tb) * tb
        if (Bp - B) <= max_pad_frac * Bp:
            return tb
    return 8                                  # fallback: minimal padding per-tile


def _vmem_limit_bytes():
    """Generation-aware scoped-VMEM limit (weights ~0.35 MB + ~3.5 KB/row of
    intermediates -> tb=2048 needs well under 16 MB; leave pipeline headroom)."""
    try:
        kind = jax.devices()[0].device_kind.lower()
    except Exception:
        kind = ""
    if ("v5" in kind) or ("v6" in kind):
        return 64 * 1024 * 1024               # 128 MiB physical VMEM parts
    return 48 * 1024 * 1024                   # v7x: 64 MiB physical per TC


def norm_mlp_head(x, params, *, tb_max=2048):
    """x: [B, D_in] float32. Returns [B, 1] float32."""
    B, D_in = x.shape
    (w1, b1, g1, be1, w2, b2, g2, be2, w3, b3) = params

    tb = _choose_tile(B, tb_max=tb_max)
    Bp = -(-B // tb) * tb
    xp = x if Bp == B else jnp.pad(x, ((0, Bp - B), (0, 0)))

    # bf16 matmul operands (f32 accumulation happens on the MXU).
    w1b = w1.astype(jnp.bfloat16)
    w2b = w2.astype(jnp.bfloat16)
    # fc3 weight as a [1, H2] row for the VPU reduction path.
    w3r = w3.reshape(1, H2).astype(jnp.float32)

    # Weights / biases / LN params are grid-invariant: single-buffer them to
    # halve their VMEM footprint (frees headroom for the large batch tile).
    def full(shape):
        return pl.BlockSpec(shape, lambda i: (0, 0), pipeline_mode=pl.Buffered(1))

    out = pl.pallas_call(
        norm_mlp_head_kernel,
        out_shape=jax.ShapeDtypeStruct((Bp, 1), jnp.float32),
        grid_spec=pltpu.PrefetchScalarGridSpec(
            num_scalar_prefetch=0,
            grid=(Bp // tb,),
            in_specs=[
                pl.BlockSpec((tb, D_in), lambda i: (i, 0)),   # x tile (double-buffered)
                full((D_in, H1)), full((1, H1)), full((1, H1)), full((1, H1)),
                full((H1, H2)),   full((1, H2)), full((1, H2)), full((1, H2)),
                full((1, H2)),    full((1, 1)),
            ],
            out_specs=pl.BlockSpec((tb, 1), lambda i: (i, 0)),
        ),
        compiler_params=pltpu.CompilerParams(
            dimension_semantics=("parallel",),
            vmem_limit_bytes=_vmem_limit_bytes(),
        ),
    )(xp, w1b, b1, g1, be1, w2b, b2, g2, be2, w3r, b3)

    return out[:B]


def init_params(key, d_in):
    """Deterministic synthetic parameters (PyTorch Linear-style uniform init)."""
    ks = jax.random.split(key, 6)

    def linear(kw, kb, fan_in, fan_out):
        bound = 1.0 / jnp.sqrt(fan_in)
        w = jax.random.uniform(kw, (fan_in, fan_out), jnp.float32, -bound, bound)
        b = jax.random.uniform(kb, (1, fan_out), jnp.float32, -bound, bound)
        return w, b

    w1, b1 = linear(ks[0], ks[1], d_in, H1)
    w2, b2 = linear(ks[2], ks[3], H1, H2)
    w3, b3 = linear(ks[4], ks[5], H2, 1)
    # LayerNorm affine params: gamma=1, beta=0 (PyTorch default init).
    g1, be1 = jnp.ones((1, H1), jnp.float32), jnp.zeros((1, H1), jnp.float32)
    g2, be2 = jnp.ones((1, H2), jnp.float32), jnp.zeros((1, H2), jnp.float32)
    return (w1, b1, g1, be1, w2, b2, g2, be2, w3, b3)


def reference(x, params):
    """Pure-JAX f32 reference (matches the PyTorch module in eval mode)."""
    (w1, b1, g1, be1, w2, b2, g2, be2, w3, b3) = params

    def ln(h, g, b):
        mu = jnp.mean(h, axis=-1, keepdims=True)
        var = jnp.mean((h - mu) ** 2, axis=-1, keepdims=True)
        return (h - mu) / jnp.sqrt(var + LN_EPS) * g + b

    h = jnp.maximum(ln(x @ w1 + b1, g1, be1), 0.0)
    h = jnp.maximum(ln(h @ w2 + b2, g2, be2), 0.0)
    return jax.nn.sigmoid(h @ w3 + b3)


if __name__ == "__main__":
    key = jax.random.PRNGKey(0)
    k_x, k_p, k_x2 = jax.random.split(key, 3)

    D_in = 32
    params = init_params(k_p, D_in)

    # Small-batch correctness check (tile clamps to tb=8, single grid step).
    B = 8
    x = jax.random.normal(k_x, (B, D_in), jnp.float32)
    out = jax.block_until_ready(norm_mlp_head(x, params))
    ref = reference(x, params)
    assert out.shape == (B, 1)
    # bf16 matmul operands vs f32 reference -> slightly loosened tolerance.
    assert jnp.allclose(out, ref, atol=2e-2, rtol=2e-2), (out, ref)

    # Exercise the multi-step / padded path (adaptive tile -> >=2 grid steps,
    # last-tile padding kept small).
    B2 = 300
    x2 = jax.random.normal(k_x2, (B2, D_in), jnp.float32)
    out2 = jax.block_until_ready(norm_mlp_head(x2, params))
    ref2 = reference(x2, params)
    assert out2.shape == (B2, 1)
    assert jnp.allclose(out2, ref2, atol=2e-2, rtol=2e-2)

    print("KERNEL_OK")
</pallas_src>

<mosaic_0001>
module attributes {stable_mosaic.version = 11 : i64} {
  func.func @norm_mlp_head_kernel(%arg0: i32, %arg1: memref<8x32xf32, #tpu.memory_space<vmem>>, %arg2: memref<32x512xbf16, #tpu.memory_space<vmem>>, %arg3: memref<1x512xf32, #tpu.memory_space<vmem>>, %arg4: memref<1x512xf32, #tpu.memory_space<vmem>>, %arg5: memref<1x512xf32, #tpu.memory_space<vmem>>, %arg6: memref<512x256xbf16, #tpu.memory_space<vmem>>, %arg7: memref<1x256xf32, #tpu.memory_space<vmem>>, %arg8: memref<1x256xf32, #tpu.memory_space<vmem>>, %arg9: memref<1x256xf32, #tpu.memory_space<vmem>>, %arg10: memref<1x256xf32, #tpu.memory_space<vmem>>, %arg11: memref<1x1xf32, #tpu.memory_space<vmem>>, %arg12: memref<8x1xf32, #tpu.memory_space<vmem>>) attributes {dimension_semantics = [#tpu.dimension_semantics<parallel>], iteration_bounds = array<i64: 1>, scalar_prefetch = 0 : i64, scratch_operands = 0 : i64, tpu.core_type = #tpu.core_type<tc>, window_params = [{transform_indices = @transform_0, window_bounds = array<i64: 8, 32>}, {pipeline_mode = #tpu.pipeline_mode<synchronous>, transform_indices = @transform_1, window_bounds = array<i64: 32, 512>}, {pipeline_mode = #tpu.pipeline_mode<synchronous>, transform_indices = @transform_2, window_bounds = array<i64: 1, 512>}, {pipeline_mode = #tpu.pipeline_mode<synchronous>, transform_indices = @transform_3, window_bounds = array<i64: 1, 512>}, {pipeline_mode = #tpu.pipeline_mode<synchronous>, transform_indices = @transform_4, window_bounds = array<i64: 1, 512>}, {pipeline_mode = #tpu.pipeline_mode<synchronous>, transform_indices = @transform_5, window_bounds = array<i64: 512, 256>}, {pipeline_mode = #tpu.pipeline_mode<synchronous>, transform_indices = @transform_6, window_bounds = array<i64: 1, 256>}, {pipeline_mode = #tpu.pipeline_mode<synchronous>, transform_indices = @transform_7, window_bounds = array<i64: 1, 256>}, {pipeline_mode = #tpu.pipeline_mode<synchronous>, transform_indices = @transform_8, window_bounds = array<i64: 1, 256>}, {pipeline_mode = #tpu.pipeline_mode<synchronous>, transform_indices = @transform_9, window_bounds = array<i64: 1, 256>}, {pipeline_mode = #tpu.pipeline_mode<synchronous>, transform_indices = @transform_10, window_bounds = array<i64: 1, 1>}, {transform_indices = @transform_11, window_bounds = array<i64: 8, 1>}]} {
    %c0 = arith.constant 0 : index
    %c0_0 = arith.constant 0 : index
    %0 = vector.load %arg1[%c0, %c0_0] : memref<8x32xf32, #tpu.memory_space<vmem>>, vector<8x32xf32>
    %1 = arith.truncf %0 : vector<8x32xf32> to vector<8x32xbf16>
    %c0_1 = arith.constant 0 : index
    %c0_2 = arith.constant 0 : index
    %2 = vector.load %arg2[%c0_1, %c0_2] : memref<32x512xbf16, #tpu.memory_space<vmem>>, vector<32x512xbf16>
    %cst = arith.constant dense<0.000000e+00> : vector<8x512xf32>
    %3 = tpu.matmul %1, %2, %cst {dimension_numbers = #tpu.dot_dimension_numbers<[1], [0], [0], [1], [0, 0, 1, 1], [], []>} : vector<8x32xbf16>, vector<32x512xbf16>, vector<8x512xf32> -> vector<8x512xf32>
    %c0_3 = arith.constant 0 : index
    %c0_4 = arith.constant 0 : index
    %4 = vector.load %arg3[%c0_3, %c0_4] : memref<1x512xf32, #tpu.memory_space<vmem>>, vector<1x512xf32>
    %5 = vector.broadcast %4 : vector<1x512xf32> to vector<8x512xf32>
    %6 = arith.addf %3, %5 : vector<8x512xf32>
    %c0_5 = arith.constant 0 : index
    %c0_6 = arith.constant 0 : index
    %7 = vector.load %arg4[%c0_5, %c0_6] : memref<1x512xf32, #tpu.memory_space<vmem>>, vector<1x512xf32>
    %c0_7 = arith.constant 0 : index
    %c0_8 = arith.constant 0 : index
    %8 = vector.load %arg5[%c0_7, %c0_8] : memref<1x512xf32, #tpu.memory_space<vmem>>, vector<1x512xf32>
    %cst_9 = arith.constant dense<0.000000e+00> : vector<8xf32>
    %9 = vector.multi_reduction <add>, %6, %cst_9 [1] : vector<8x512xf32> to vector<8xf32>
    %10 = vector.shape_cast %9 : vector<8xf32> to vector<8x1xf32>
    %cst_10 = arith.constant 5.120000e+02 : f32
    %11 = vector.broadcast %cst_10 : f32 to vector<8x1xf32>
    %12 = arith.divf %10, %11 : vector<8x1xf32>
    %13 = vector.broadcast %12 : vector<8x1xf32> to vector<8x512xf32>
    %14 = arith.subf %6, %13 : vector<8x512xf32>
    %15 = vector.broadcast %12 : vector<8x1xf32> to vector<8x512xf32>
    %16 = arith.subf %6, %15 : vector<8x512xf32>
    %17 = arith.mulf %14, %16 : vector<8x512xf32>
    %cst_11 = arith.constant dense<0.000000e+00> : vector<8xf32>
    %18 = vector.multi_reduction <add>, %17, %cst_11 [1] : vector<8x512xf32> to vector<8xf32>
    %19 = vector.shape_cast %18 : vector<8xf32> to vector<8x1xf32>
    %cst_12 = arith.constant 5.120000e+02 : f32
    %20 = vector.broadcast %cst_12 : f32 to vector<8x1xf32>
    %21 = arith.divf %19, %20 : vector<8x1xf32>
    %22 = vector.broadcast %12 : vector<8x1xf32> to vector<8x512xf32>
    %23 = arith.subf %6, %22 : vector<8x512xf32>
    %cst_13 = arith.constant 9.99999974E-6 : f32
    %24 = vector.broadcast %cst_13 : f32 to vector<8x1xf32>
    %25 = arith.addf %21, %24 : vector<8x1xf32>
    %26 = math.rsqrt %25 : vector<8x1xf32>
    %27 = vector.broadcast %26 : vector<8x1xf32> to vector<8x512xf32>
    %28 = arith.mulf %23, %27 : vector<8x512xf32>
    %29 = vector.broadcast %7 : vector<1x512xf32> to vector<8x512xf32>
    %30 = arith.mulf %28, %29 : vector<8x512xf32>
    %31 = vector.broadcast %8 : vector<1x512xf32> to vector<8x512xf32>
    %32 = arith.addf %30, %31 : vector<8x512xf32>
    %cst_14 = arith.constant 0.000000e+00 : f32
    %33 = vector.broadcast %cst_14 : f32 to vector<8x512xf32>
    %34 = arith.maximumf %32, %33 : vector<8x512xf32>
    %35 = arith.truncf %34 : vector<8x512xf32> to vector<8x512xbf16>
    %c0_15 = arith.constant 0 : index
    %c0_16 = arith.constant 0 : index
    %36 = vector.load %arg6[%c0_15, %c0_16] : memref<512x256xbf16, #tpu.memory_space<vmem>>, vector<512x256xbf16>
    %cst_17 = arith.constant dense<0.000000e+00> : vector<8x256xf32>
    %37 = tpu.matmul %35, %36, %cst_17 {dimension_numbers = #tpu.dot_dimension_numbers<[1], [0], [0], [1], [0, 0, 1, 1], [], []>} : vector<8x512xbf16>, vector<512x256xbf16>, vector<8x256xf32> -> vector<8x256xf32>
    %c0_18 = arith.constant 0 : index
    %c0_19 = arith.constant 0 : index
    %38 = vector.load %arg7[%c0_18, %c0_19] : memref<1x256xf32, #tpu.memory_space<vmem>>, vector<1x256xf32>
    %39 = vector.broadcast %38 : vector<1x256xf32> to vector<8x256xf32>
    %40 = arith.addf %37, %39 : vector<8x256xf32>
    %c0_20 = arith.constant 0 : index
    %c0_21 = arith.constant 0 : index
    %41 = vector.load %arg8[%c0_20, %c0_21] : memref<1x256xf32, #tpu.memory_space<vmem>>, vector<1x256xf32>
    %c0_22 = arith.constant 0 : index
    %c0_23 = arith.constant 0 : index
    %42 = vector.load %arg9[%c0_22, %c0_23] : memref<1x256xf32, #tpu.memory_space<vmem>>, vector<1x256xf32>
    %cst_24 = arith.constant dense<0.000000e+00> : vector<8xf32>
    %43 = vector.multi_reduction <add>, %40, %cst_24 [1] : vector<8x256xf32> to vector<8xf32>
    %44 = vector.shape_cast %43 : vector<8xf32> to vector<8x1xf32>
    %cst_25 = arith.constant 2.560000e+02 : f32
    %45 = vector.broadcast %cst_25 : f32 to vector<8x1xf32>
    %46 = arith.divf %44, %45 : vector<8x1xf32>
    %47 = vector.broadcast %46 : vector<8x1xf32> to vector<8x256xf32>
    %48 = arith.subf %40, %47 : vector<8x256xf32>
    %49 = vector.broadcast %46 : vector<8x1xf32> to vector<8x256xf32>
    %50 = arith.subf %40, %49 : vector<8x256xf32>
    %51 = arith.mulf %48, %50 : vector<8x256xf32>
    %cst_26 = arith.constant dense<0.000000e+00> : vector<8xf32>
    %52 = vector.multi_reduction <add>, %51, %cst_26 [1] : vector<8x256xf32> to vector<8xf32>
    %53 = vector.shape_cast %52 : vector<8xf32> to vector<8x1xf32>
    %cst_27 = arith.constant 2.560000e+02 : f32
    %54 = vector.broadcast %cst_27 : f32 to vector<8x1xf32>
    %55 = arith.divf %53, %54 : vector<8x1xf32>
    %56 = vector.broadcast %46 : vector<8x1xf32> to vector<8x256xf32>
    %57 = arith.subf %40, %56 : vector<8x256xf32>
    %cst_28 = arith.constant 9.99999974E-6 : f32
    %58 = vector.broadcast %cst_28 : f32 to vector<8x1xf32>
    %59 = arith.addf %55, %58 : vector<8x1xf32>
    %60 = math.rsqrt %59 : vector<8x1xf32>
    %61 = vector.broadcast %60 : vector<8x1xf32> to vector<8x256xf32>
    %62 = arith.mulf %57, %61 : vector<8x256xf32>
    %63 = vector.broadcast %41 : vector<1x256xf32> to vector<8x256xf32>
    %64 = arith.mulf %62, %63 : vector<8x256xf32>
    %65 = vector.broadcast %42 : vector<1x256xf32> to vector<8x256xf32>
    %66 = arith.addf %64, %65 : vector<8x256xf32>
    %cst_29 = arith.constant 0.000000e+00 : f32
    %67 = vector.broadcast %cst_29 : f32 to vector<8x256xf32>
    %68 = arith.maximumf %66, %67 : vector<8x256xf32>
    %c0_30 = arith.constant 0 : index
    %c0_31 = arith.constant 0 : index
    %69 = vector.load %arg10[%c0_30, %c0_31] : memref<1x256xf32, #tpu.memory_space<vmem>>, vector<1x256xf32>
    %70 = vector.broadcast %69 : vector<1x256xf32> to vector<8x256xf32>
    %71 = arith.mulf %68, %70 : vector<8x256xf32>
    %cst_32 = arith.constant dense<0.000000e+00> : vector<8xf32>
    %72 = vector.multi_reduction <add>, %71, %cst_32 [1] : vector<8x256xf32> to vector<8xf32>
    %73 = vector.shape_cast %72 : vector<8xf32> to vector<8x1xf32>
    %c0_33 = arith.constant 0 : index
    %c0_34 = arith.constant 0 : index
    %74 = vector.load %arg11[%c0_33, %c0_34] : memref<1x1xf32, #tpu.memory_space<vmem>>, vector<1x1xf32>
    %75 = vector.broadcast %74 : vector<1x1xf32> to vector<8x1xf32>
    %76 = arith.addf %73, %75 : vector<8x1xf32>
    %77 = arith.negf %76 : vector<8x1xf32>
    %78 = math.exp %77 : vector<8x1xf32>
    %cst_35 = arith.constant 1.000000e+00 : f32
    %79 = vector.broadcast %cst_35 : f32 to vector<8x1xf32>
    %80 = arith.addf %79, %78 : vector<8x1xf32>
    %81 = arith.divf %79, %80 : vector<8x1xf32>
    %c0_36 = arith.constant 0 : index
    %c0_37 = arith.constant 0 : index
    %82 = vector.load %arg12[%c0_36, %c0_37] : memref<8x1xf32, #tpu.memory_space<vmem>>, vector<8x1xf32>
    tpu.vector_store %arg12[%c0_36, %c0_37], %81 {strides = array<i32>} : memref<8x1xf32, #tpu.memory_space<vmem>>, vector<8x1xf32>,
    return
  }
  func.func @transform_0(%arg0: i32) -> (i32, i32) {
    %c0_i32 = arith.constant 0 : i32
    %c0_i32_0 = arith.constant 0 : i32
    return %arg0, %c0_i32 : i32, i32
  }
  func.func @transform_1(%arg0: i32) -> (i32, i32) {
    %c0_i32 = arith.constant 0 : i32
    %c0_i32_0 = arith.constant 0 : i32
    %c0_i32_1 = arith.constant 0 : i32
    return %c0_i32, %c0_i32_0 : i32, i32
  }
  func.func @transform_2(%arg0: i32) -> (i32, i32) {
    %c0_i32 = arith.constant 0 : i32
    %c0_i32_0 = arith.constant 0 : i32
    %c0_i32_1 = arith.constant 0 : i32
    return %c0_i32, %c0_i32_0 : i32, i32
  }
  func.func @transform_3(%arg0: i32) -> (i32, i32) {
    %c0_i32 = arith.constant 0 : i32
    %c0_i32_0 = arith.constant 0 : i32
    %c0_i32_1 = arith.constant 0 : i32
    return %c0_i32, %c0_i32_0 : i32, i32
  }
  func.func @transform_4(%arg0: i32) -> (i32, i32) {
    %c0_i32 = arith.constant 0 : i32
    %c0_i32_0 = arith.constant 0 : i32
    %c0_i32_1 = arith.constant 0 : i32
    return %c0_i32, %c0_i32_0 : i32, i32
  }
  func.func @transform_5(%arg0: i32) -> (i32, i32) {
    %c0_i32 = arith.constant 0 : i32
    %c0_i32_0 = arith.constant 0 : i32
    %c0_i32_1 = arith.constant 0 : i32
    return %c0_i32, %c0_i32_0 : i32, i32
  }
  func.func @transform_6(%arg0: i32) -> (i32, i32) {
    %c0_i32 = arith.constant 0 : i32
    %c0_i32_0 = arith.constant 0 : i32
    %c0_i32_1 = arith.constant 0 : i32
    return %c0_i32, %c0_i32_0 : i32, i32
  }
  func.func @transform_7(%arg0: i32) -> (i32, i32) {
    %c0_i32 = arith.constant 0 : i32
    %c0_i32_0 = arith.constant 0 : i32
    %c0_i32_1 = arith.constant 0 : i32
    return %c0_i32, %c0_i32_0 : i32, i32
  }
  func.func @transform_8(%arg0: i32) -> (i32, i32) {
    %c0_i32 = arith.constant 0 : i32
    %c0_i32_0 = arith.constant 0 : i32
    %c0_i32_1 = arith.constant 0 : i32
    return %c0_i32, %c0_i32_0 : i32, i32
  }
  func.func @transform_9(%arg0: i32) -> (i32, i32) {
    %c0_i32 = arith.constant 0 : i32
    %c0_i32_0 = arith.constant 0 : i32
    %c0_i32_1 = arith.constant 0 : i32
    return %c0_i32, %c0_i32_0 : i32, i32
  }
  func.func @transform_10(%arg0: i32) -> (i32, i32) {
    %c0_i32 = arith.constant 0 : i32
    %c0_i32_0 = arith.constant 0 : i32
    %c0_i32_1 = arith.constant 0 : i32
    return %c0_i32, %c0_i32_0 : i32, i32
  }
  func.func @transform_11(%arg0: i32) -> (i32, i32) {
    %c0_i32 = arith.constant 0 : i32
    %c0_i32_0 = arith.constant 0 : i32
    return %arg0, %c0_i32 : i32, i32
  }
}

</mosaic_0001>

<bundles_post_ra>
// kernel: tpu_custom_call.1
= control target key start
LH: loop header
LB: loop body
LE: loop exit
PB: predicated region body
PF: predicated region fallthrough
CT: control target
= control target key end

     0   :  { %s1605_s0 = inlined_call_operand.hbm [shape: f32[8,32], index: 0, kind: input, shape index: {}]   ;;  %s1606_s1 = inlined_call_operand.hbm [shape: bf16[32,512], index: 1, kind: input, shape index: {}]   ;;  %s1607_s2 = inlined_call_operand.hbm [shape: f32[1,512], index: 2, kind: input, shape index: {}]   ;;  %s1608_s3 = inlined_call_operand.vmem [shape: f32[1,512], index: 3, kind: input, shape index: {}]   ;;  %s1609_s4 = inlined_call_operand.hbm [shape: f32[1,512], index: 4, kind: input, shape index: {}]   ;;  %s1610_s5 = inlined_call_operand.hbm [shape: bf16[512,256], index: 5, kind: input, shape index: {}]   ;;  %s1611_s6 = inlined_call_operand.vmem [shape: f32[1,256], index: 6, kind: input, shape index: {}]   ;;  %s1612_s7 = inlined_call_operand.vmem [shape: f32[1,256], index: 7, kind: input, shape index: {}]   ;;  %s1613_s8 = inlined_call_operand.hbm [shape: f32[1,256], index: 8, kind: input, shape index: {}]   ;;  %s1614_s9 = inlined_call_operand.vmem [shape: f32[1,256], index: 9, kind: input, shape index: {}]   ;;  %s1615_s10 = inlined_call_operand.<no memory space> [shape: f32[1,1], index: 10, kind: input, shape index: {}]   ;;  %s1616_s11 = inlined_call_operand.vmem [shape: f32[8,1], index: 11, kind: output, shape index: {}]  }
   0x1   :  { %v16_v0 = vstv %s1615_s10 }
   0x2   :  { %17 = vst [vmem:[#allocation2] sm:$0x1] %v16_v0 }
   0x3   :  { %18 = vsyncpa [#allocation4], 0 }
   0x4   :  { %19 = vsyncpa [#allocation6], 0 }
   0x5   :  { %20 = vsyncpa [#allocation9], 0  ;;  %s37_s21 = sshll.u32 %s1606_s1, 4  ;;  %s38_s21 = int_to_ptr.hbm [resolvable:$true] %s37_s21 }
   0x6   :  { %21 = vsyncpa [#allocation12], 0  ;;  %s1452_s22 = smov [#allocation5]   ;;  %s64_s26 = sshll.u32 %s1609_s4, 4  ;;  %s65_s26 = int_to_ptr.hbm [resolvable:$true] %s64_s26 }
   0x7   :  { %s39_s23 = sshll.u32 %s1452_s22, 4  ;;  %s1453_s27 = smov 256   ;;  %s40_s23 = int_to_ptr.vmem [resolvable:$true] %s39_s23 }
   0x8   :  { %s1454_s28 = smov 16   ;;  %s1455_s10 = smov [#allocation8]  }
   0x9   :  { %45 = dma.hbm_to_vmem [thread:$0]  %s38_s21, 1024, %s40_s23, [#allocation6], %s1453_s27, %s1453_s27, %s1454_s28  }
   0xa   :  { %s66_s29 = sshll.u32 %s1455_s10, 4  ;;  %s27_s13 = sshll.u32 %s1605_s0, 4  ;;  %s67_s29 = int_to_ptr.vmem [resolvable:$true] %s66_s29  ;;  %s28_s13 = int_to_ptr.hbm [resolvable:$true] %s27_s13 }
   0xb   :  { %69 = dma.hbm_to_vmem [thread:$0]  %s65_s26, 64, %s67_s29, [#allocation9]  }
   0xc   :  { %s51_s15 = sshll.u32 %s1607_s2, 4  ;;  %s1456_s16 = smov [#allocation3]   ;;  %s52_s15 = int_to_ptr.hbm [resolvable:$true] %s51_s15 }
   0xd   :  { %s29_s17 = sshll.u32 %s1456_s16, 4  ;;  %s1457_s4 = smov [#allocation7]   ;;  %s30_s17 = int_to_ptr.vmem [resolvable:$true] %s29_s17 }
   0xe   :  { %32 = dma.hbm_to_vmem [thread:$0]  %s28_s13, 128, %s30_s17, [#allocation4]  }
   0xf   :  { %s53_s18 = sshll.u32 %s1457_s4, 4  ;;  %s74_s21 = sshll.u32 %s1610_s5, 4  ;;  %s54_s18 = int_to_ptr.vmem [resolvable:$true] %s53_s18  ;;  %s75_s21 = int_to_ptr.hbm [resolvable:$true] %s74_s21 }
  0x10   :  { %56 = dma.hbm_to_vmem [thread:$0]  %s52_s15, 64, %s54_s18, [#allocation6]  }
  0x11   :  { %s1458_s0 = smov [#allocation10]   ;;  %s92_s2 = sshll.u32 %s1613_s8, 4  ;;  %s93_s2 = int_to_ptr.hbm [resolvable:$true] %s92_s2 }
  0x12   :  { %s76_s22 = sshll.u32 %s1458_s0, 4  ;;  %s1459_s25 = smov 128   ;;  %s77_s22 = int_to_ptr.vmem [resolvable:$true] %s76_s22 }
  0x13   :  { %s1460_s26 = smov 8   ;;  %s1461_s27 = smov [#allocation11]  }
  0x14   :  { %82 = dma.hbm_to_vmem [thread:$0]  %s75_s21, 8192, %s77_s22, [#allocation9], %s1459_s25, %s1459_s25, %s1460_s26  }
  0x15   :  { %s94_s28 = sshll.u32 %s1461_s27, 4  ;;  %s95_s28 = int_to_ptr.vmem [resolvable:$true] %s94_s28 }
  0x16   :  { %97 = dma.hbm_to_vmem [thread:$0]  %s93_s2, 32, %s95_s28, [#allocation12]  }
  0x17   :  { %1444 = dma.done.wait [#allocation4], 128  }
  0x18   :  { %1445 = vsyncadd [#allocation4], 4294967168 }
  0x19   :  { %1446 = dma.done.wait [#allocation6], 1088  }
  0x1a   :  { %1447 = vsyncadd [#allocation6], 4294966208 }
  0x1b   :  { %1448 = dma.done.wait [#allocation9], 8256  }
  0x1c   :  { %1449 = vsyncadd [#allocation9], 4294959040 }
  0x1d   :  { %1450 = dma.done.wait [#allocation12], 32  }
  0x1e   :  { %1451 = vsyncadd [#allocation12], 4294967264  ;;  %v928_v1 = vld [vmem:[#allocation5 + $0x20] sm:$0xf]  ;;  %v1209_v2 = vld [vmem:[#allocation5 + $0x2c] sm:$0xf0] }
  0x1f   :  { %v1207_v3 = vld [vmem:[#allocation5 + $0x24] sm:$0xf]  ;;  %v929_v4 = vor.u32 %v1209_v2, %v928_v1  ;;  %v930_v5 = vld [vmem:[#allocation5 + $0x30] sm:$0xf0]  ;;  %v936_v6 = vld [vmem:[#allocation5 + $0x28] sm:$0xf] }
  0x20   :  { %v1210_v7 = vld [vmem:[#allocation5 + $0x34] sm:$0xf0]  ;;  %v933_v8 = vor.u32 %v1207_v3, %v930_v5  ;;  %v1208_v10 = vld [vmem:[#allocation5 + $0x2c] sm:$0xf]  ;;  %v938_v11 = vld [vmem:[#allocation5 + $0x38] sm:$0xf0] }
  0x21   :  { %v937_v9 = vor.u32 %v1210_v7, %v936_v6  ;;  %v912_v12 = vld [vmem:[#allocation5] sm:$0xf]  ;;  %197 = vmatpush.bf16.msra.mxu0 %v929_v4  ;;  %v941_v13 = vor.u32 %v1208_v10, %v938_v11  ;;  %v1205_v14 = vld [vmem:[#allocation5 + $0xc] sm:$0xf0]  ;;  %v1203_v15 = vld [vmem:[#allocation5 + $0x4] sm:$0xf] }
  0x22   :  { %v914_v16 = vld [vmem:[#allocation5 + $0x10] sm:$0xf0]  ;;  %210 = vmatpush.bf16.msra.mxu1 %v933_v8  ;;  %v913_v17 = vor.u32 %v1205_v14, %v912_v12  ;;  %v920_v19 = vld [vmem:[#allocation5 + $0x8] sm:$0xf]  ;;  %v1206_v20 = vld [vmem:[#allocation5 + $0x14] sm:$0xf0] }
  0x23   :  { %223 = vmatpush.bf16.msra.mxu2 %v937_v9  ;;  %v917_v18 = vor.u32 %v1203_v15, %v914_v16  ;;  %v1204_v21 = vld [vmem:[#allocation5 + $0xc] sm:$0xf]  ;;  %236 = vmatpush.bf16.msra.mxu3 %v941_v13  ;;  %v921_v22 = vor.u32 %v1206_v20, %v920_v19  ;;  %v922_v23 = vld [vmem:[#allocation5 + $0x18] sm:$0xf0]  ;;  %vm187_vm0 = vcmask 261120   ;;  %v1462_v47 = vmov 512.0  }
  0x24   :  { %v127_v24 = vld [vmem:[#allocation3] sm:$0xff]  ;;  %v925_v25 = vor.u32 %v1204_v21, %v922_v23  ;;  %v137_v27 = vld [vmem:[#allocation7] sm:$0xf]  ;;  %1288 = vrcp.f32 %v1462_v47  ;;  %v996_v62 = vld [vmem:[#allocation10 + $0x60] sm:$0xf]  ;;  %vm900_vm11 = vcmask 7168  }
  0x25   :  { %v128_v26 = vpack.c.bf16 %v127_v24, %v127_v24  ;;  %198 = vmatpush.bf16.msra.mxu0 %v913_v17  ;;  %v139_v28 = vperm.slane %v137_v27, 0  ;;  %v140_v29 = vperm.slane %v137_v27, 1  ;;  %v141_v34 = vperm.slane %v137_v27, 2  ;;  %v1004_v51 = vld [vmem:[#allocation10 + $0x70] sm:$0xf] }
  0x26   :  { %211 = vmatpush.bf16.msra.mxu1 %v917_v18  ;;  %v142_v35 = vperm.slane %v137_v27, 3  ;;  %v1226_v52 = vld [vmem:[#allocation10 + $0x74] sm:$0xf0]  ;;  %v1068_v53 = vld [vmem:[#allocation10 + $0xf0] sm:$0xf] }
  0x27   :  { %224 = vmatpush.bf16.msra.mxu2 %v921_v22  ;;  %237 = vmatpush.bf16.msra.mxu3 %v925_v25  ;;  %v1005_v54 = vor.u32 %v1226_v52, %v1004_v51  ;;  %v1242_v55 = vld [vmem:[#allocation10 + $0xf4] sm:$0xf0]  ;;  %v1132_v56 = vld [vmem:[#allocation10 + $0x170] sm:$0xf]  ;;  %v1224_v0 = vld [vmem:[#allocation10 + $0x64] sm:$0xf0] }
  0x28   :  { %942 = vmatmul.msk.bf16.vlgmr.msra.gmra.mxu0 %vm187_vm0, %v128_v26  ;;  %v1258_v57 = vld [vmem:[#allocation10 + $0x174] sm:$0xf0]  ;;  %v1069_v58 = vor.u32 %v1242_v55, %v1068_v53  ;;  %v1196_v60 = vld [vmem:[#allocation10 + $0x1f0] sm:$0xf]  ;;  %v1060_v1 = vld [vmem:[#allocation10 + $0xe0] sm:$0xf]  ;;  %v997_v3 = vor.u32 %v1224_v0, %v996_v62 }
  0x29   :  { %943 = vmatmul.msk.bf16.vlgmr.msra.gmra.mxu1 %vm187_vm0, %v128_v26  ;;  %v1133_v59 = vor.u32 %v1258_v57, %v1132_v56  ;;  %v1274_v61 = vld [vmem:[#allocation10 + $0x1f4] sm:$0xf0]  ;;  %711 = vmatpush.bf16.msrb.mxu0 %v1005_v54  ;;  %v1240_v2 = vld [vmem:[#allocation10 + $0xe4] sm:$0xf0]  ;;  %v1124_v5 = vld [vmem:[#allocation10 + $0x160] sm:$0xf] }
  0x2a   :  { %944 = vmatmul.msk.bf16.vlgmr.msra.gmra.mxu2 %vm187_vm0, %v128_v26  ;;  %945 = vmatmul.msk.bf16.vlgmr.msra.gmra.mxu3 %vm187_vm0, %v128_v26  ;;  %v1289_v48 = vpop.eup %1288  ;;  %v1197_v63 = vor.u32 %v1274_v61, %v1196_v60  ;;  %v1061_v4 = vor.u32 %v1240_v2, %v1060_v1  ;;  %v1256_v6 = vld [vmem:[#allocation10 + $0x164] sm:$0xf0]  ;;  %v1188_v7 = vld [vmem:[#allocation10 + $0x1e0] sm:$0xf]  ;;  %v988_v10 = vld [vmem:[#allocation10 + $0x50] sm:$0xf] }
  0x2b   :  { %v251_v49 = vmul.f32 512.0, %v1289_v48  ;;  %724 = vmatpush.bf16.msrb.mxu1 %v1069_v58  ;;  %737 = vmatpush.bf16.msrb.mxu2 %v1133_v59  ;;  %v1125_v8 = vor.u32 %v1256_v6, %v1124_v5  ;;  %v1272_v9 = vld [vmem:[#allocation10 + $0x1e4] sm:$0xf0]  ;;  %v1222_v11 = vld [vmem:[#allocation10 + $0x54] sm:$0xf0]  ;;  %vm255_vm1 = vweird.f32 %v1289_v48 }
  0x2c   :  { %750 = vmatpush.bf16.msrb.mxu3 %v1197_v63  ;;  %v1189_v12 = vor.u32 %v1272_v9, %v1188_v7  ;;  %v1052_v13 = vld [vmem:[#allocation10 + $0xd0] sm:$0xf]  ;;  %v1238_v14 = vld [vmem:[#allocation10 + $0xd4] sm:$0xf0]  ;;  %v989_v16 = vor.u32 %v1222_v11, %v988_v10  ;;  %v964_v63 = vld [vmem:[#allocation10 + $0x20] sm:$0xf] }
  0x2d   :  { %v252_v50 = vsub.f32 1.0, %v251_v49  ;;  %v1116_v15 = vld [vmem:[#allocation10 + $0x150] sm:$0xf]  ;;  %712 = vmatpush.bf16.msrb.mxu0 %v997_v3  ;;  %v1254_v17 = vld [vmem:[#allocation10 + $0x154] sm:$0xf0]  ;;  %v1053_v20 = vor.u32 %v1238_v14, %v1052_v13 }
  0x2e   :  { %v1180_v18 = vld [vmem:[#allocation10 + $0x1d0] sm:$0xf]  ;;  %v1270_v19 = vld [vmem:[#allocation10 + $0x1d4] sm:$0xf0]  ;;  %v1117_v21 = vor.u32 %v1254_v17, %v1116_v15  ;;  %v1268_v49 = vld [vmem:[#allocation10 + $0x1c4] sm:$0xf0] }
  0x2f   :  { %725 = vmatpush.bf16.msrb.mxu1 %v1061_v4  ;;  %738 = vmatpush.bf16.msrb.mxu2 %v1125_v8  ;;  %v253_v22 = vmul.f32 %v1289_v48, %v252_v50  ;;  %v1181_v23 = vor.u32 %v1270_v19, %v1180_v18  ;;  %v972_v51 = vld [vmem:[#allocation10 + $0x30] sm:$0xf]  ;;  %v1218_v52 = vld [vmem:[#allocation10 + $0x34] sm:$0xf0]  ;;  %v1216_v0 = vld [vmem:[#allocation10 + $0x24] sm:$0xf0] }
  0x30   :  { %751 = vmatpush.bf16.msrb.mxu3 %v1189_v12  ;;  %v1036_v53 = vld [vmem:[#allocation10 + $0xb0] sm:$0xf]  ;;  %v973_v54 = vor.u32 %v1218_v52, %v972_v51  ;;  %v1234_v55 = vld [vmem:[#allocation10 + $0xb4] sm:$0xf0]  ;;  %v1028_v1 = vld [vmem:[#allocation10 + $0xa0] sm:$0xf]  ;;  %v965_v2 = vor.u32 %v1216_v0, %v964_v63 }
  0x31   :  { %713 = vmatpush.bf16.msrb.mxu0 %v989_v16  ;;  %v254_v24 = vadd.f32 %v1289_v48, %v253_v22  ;;  %v1100_v56 = vld [vmem:[#allocation10 + $0x130] sm:$0xf]  ;;  %v1250_v57 = vld [vmem:[#allocation10 + $0x134] sm:$0xf0]  ;;  %v1037_v58 = vor.u32 %v1234_v55, %v1036_v53  ;;  %v1232_v3 = vld [vmem:[#allocation10 + $0xa4] sm:$0xf0] }
  0x32   :  { %v1101_v59 = vor.u32 %v1250_v57, %v1100_v56  ;;  %v1164_v60 = vld [vmem:[#allocation10 + $0x1b0] sm:$0xf]  ;;  %v1266_v61 = vld [vmem:[#allocation10 + $0x1b4] sm:$0xf0]  ;;  %v1092_v4 = vld [vmem:[#allocation10 + $0x120] sm:$0xf]  ;;  %v1029_v6 = vor.u32 %v1232_v3, %v1028_v1 }
  0x33   :  { %726 = vmatpush.bf16.msrb.mxu1 %v1053_v20  ;;  %739 = vmatpush.bf16.msrb.mxu2 %v1117_v21  ;;  %v1557_v25 = vsel %vm255_vm1, %v1289_v48, %v254_v24  ;;  %v1172_v48 = vld [vmem:[#allocation10 + $0x1c0] sm:$0xf]  ;;  %v1165_v62 = vor.u32 %v1266_v61, %v1164_v60  ;;  %v1248_v5 = vld [vmem:[#allocation10 + $0x124] sm:$0xf0]  ;;  %v956_v11 = vld [vmem:[#allocation10 + $0x10] sm:$0xf] }
  0x34   :  { %752 = vmatpush.bf16.msrb.mxu3 %v1181_v23  ;;  %v1173_v50 = vor.u32 %v1268_v49, %v1172_v48  ;;  %v1093_v7 = vor.u32 %v1248_v5, %v1092_v4  ;;  %v1156_v8 = vld [vmem:[#allocation10 + $0x1a0] sm:$0xf]  ;;  %v1264_v9 = vld [vmem:[#allocation10 + $0x1a4] sm:$0xf0]  ;;  %v1214_v12 = vld [vmem:[#allocation10 + $0x14] sm:$0xf0] }
  0x35   :  { %v1157_v10 = vor.u32 %v1264_v9, %v1156_v8  ;;  %v1020_v13 = vld [vmem:[#allocation10 + $0x90] sm:$0xf]  ;;  %v957_v14 = vor.u32 %v1214_v12, %v956_v11  ;;  %v1230_v15 = vld [vmem:[#allocation10 + $0x94] sm:$0xf0]  ;;  %v948_v23 = vld [vmem:[#allocation10] sm:$0xf] }
  0x36   :  { %v1084_v16 = vld [vmem:[#allocation10 + $0x110] sm:$0xf]  ;;  %v1246_v17 = vld [vmem:[#allocation10 + $0x114] sm:$0xf0]  ;;  %v1021_v18 = vor.u32 %v1230_v15, %v1020_v13  ;;  %v1212_v24 = vld [vmem:[#allocation10 + $0x4] sm:$0xf0] }
  0x37   :  { %v1085_v19 = vor.u32 %v1246_v17, %v1084_v16  ;;  %v1148_v20 = vld [vmem:[#allocation10 + $0x190] sm:$0xf]  ;;  %v1262_v21 = vld [vmem:[#allocation10 + $0x194] sm:$0xf0]  ;;  %v1273_v48 = vld [vmem:[#allocation10 + $0x1f4] sm:$0xf] }
  0x38   :  { %753 = vmatpush.bf16.msrb.mxu3 %v1173_v50  ;;  %v1149_v22 = vor.u32 %v1262_v21, %v1148_v20  ;;  %v1198_v50 = vld [vmem:[#allocation10 + $0x1f8] sm:$0xf0]  ;;  %v1223_v51 = vld [vmem:[#allocation10 + $0x64] sm:$0xf]  ;;  %v998_v52 = vld [vmem:[#allocation10 + $0x68] sm:$0xf0] }
  0x39   :  { %v1201_v53 = vor.u32 %v1273_v48, %v1198_v50  ;;  %v1239_v55 = vld [vmem:[#allocation10 + $0xe4] sm:$0xf]  ;;  %v1062_v56 = vld [vmem:[#allocation10 + $0xe8] sm:$0xf0]  ;;  %v1221_v0 = vld [vmem:[#allocation10 + $0x54] sm:$0xf] }
  0x3a   :  { %v1255_v57 = vld [vmem:[#allocation10 + $0x164] sm:$0xf]  ;;  %v1190_v61 = vld [vmem:[#allocation10 + $0x1e8] sm:$0xf0]  ;;  %v990_v1 = vld [vmem:[#allocation10 + $0x58] sm:$0xf0] }
  0x3b   :  { %v1271_v60 = vld [vmem:[#allocation10 + $0x1e4] sm:$0xf]  ;;  %v1054_v3 = vld [vmem:[#allocation10 + $0xd8] sm:$0xf0]  ;;  %v1253_v4 = vld [vmem:[#allocation10 + $0x154] sm:$0xf] }
  0x3c   :  { %754 = vmatpush.bf16.msrb.mxu3 %v1165_v62  ;;  %v1193_v63 = vor.u32 %v1271_v60, %v1190_v61  ;;  %v1118_v5 = vld [vmem:[#allocation10 + $0x158] sm:$0xf0]  ;;  %v1269_v8 = vld [vmem:[#allocation10 + $0x1d4] sm:$0xf]  ;;  %v982_v12 = vld [vmem:[#allocation10 + $0x48] sm:$0xf0] }
  0x3d   :  { %v1182_v9 = vld [vmem:[#allocation10 + $0x1d8] sm:$0xf0]  ;;  %v1121_v11 = vor.u32 %v1253_v4, %v1118_v5  ;;  %v1235_v13 = vld [vmem:[#allocation10 + $0xc4] sm:$0xf]  ;;  %v1110_v17 = vld [vmem:[#allocation10 + $0x148] sm:$0xf0] }
  0x3e   :  { %v1185_v15 = vor.u32 %v1269_v8, %v1182_v9  ;;  %v1251_v16 = vld [vmem:[#allocation10 + $0x144] sm:$0xf]  ;;  %v1094_v48 = vld [vmem:[#allocation10 + $0x128] sm:$0xf0]  ;;  %v1086_v60 = vld [vmem:[#allocation10 + $0x118] sm:$0xf0] }
  0x3f   :  { %v1261_v61 = vld [vmem:[#allocation10 + $0x194] sm:$0xf]  ;;  %v1227_v4 = vld [vmem:[#allocation10 + $0x84] sm:$0xf]  ;;  %v1014_v5 = vld [vmem:[#allocation10 + $0x88] sm:$0xf0] }
  0x40   :  { %755 = vmatpush.bf16.msrb.mxu3 %v1157_v10  ;;  %v1219_v10 = vld [vmem:[#allocation10 + $0x44] sm:$0xf]  ;;  %v1078_v9 = vld [vmem:[#allocation10 + $0x108] sm:$0xf0] }
  0x41   :  { %v985_v20 = vor.u32 %v1219_v10, %v982_v12  ;;  %v1243_v8 = vld [vmem:[#allocation10 + $0x104] sm:$0xf]  ;;  %v1142_v12 = vld [vmem:[#allocation10 + $0x188] sm:$0xf0] }
  0x44   :  { %756 = vmatpush.bf16.msrb.mxu3 %v1149_v22  ;;  %v1113_v22 = vor.u32 %v1251_v16, %v1110_v17  ;;  %v1081_v16 = vor.u32 %v1243_v8, %v1078_v9 }
  0xa5   :  { %v200_v30 = vpop.f32.mrf.mxu0 }
  0xa6   :  { %v213_v31 = vpop.f32.mrf.mxu1  ;;  %v1545_v32 = vadd.f32 %v200_v30, %v139_v28 }
  0xa7   :  { %v1547_v33 = vadd.f32 %v213_v31, %v140_v29 }
  0xa9   :  { %v245_v36 = vadd.f32 %v1547_v33, %v1545_v32 }
  0xad   :  { %v226_v37 = vpop.f32.mrf.mxu2  ;;  %v239_v39 = vpop.f32.mrf.mxu3 }
  0xae   :  { %v1551_v38 = vadd.f32 %v226_v37, %v141_v34  ;;  %v202_v40 = vpop.f32.mrf.mxu0  ;;  %v1553_v41 = vadd.f32 %v239_v39, %v142_v35  ;;  %v215_v42 = vpop.f32.mrf.mxu1 }
  0xaf   :  { %v1220_v40 = vld [vmem:[#allocation10 + $0x44] sm:$0xf0] }
  0xb0   :  { %v246_v43 = vadd.f32 %v245_v36, %v1551_v38 }
  0xb2   :  { %v247_v44 = vadd.f32 %v246_v43, %v1553_v41  ;;  %v1236_v43 = vld [vmem:[#allocation10 + $0xc4] sm:$0xf0] }
  0xb4   :  { %248 = vadd.xlane.f32.xlu0 %v247_v44  ;;  %v1108_v44 = vld [vmem:[#allocation10 + $0x140] sm:$0xf] }
  0xb5   :  { %v228_v45 = vpop.f32.mrf.mxu2  ;;  %v241_v46 = vpop.f32.mrf.mxu3 }
  0xb6   :  { %v1252_v45 = vld [vmem:[#allocation10 + $0x144] sm:$0xf0] }
  0xb7   :  { %v1109_v47 = vor.u32 %v1252_v45, %v1108_v44 }
  0xb9   :  { %740 = vmatpush.bf16.msrb.mxu2 %v1109_v47  ;;  %v1134_v47 = vld [vmem:[#allocation10 + $0x178] sm:$0xf0] }
  0xbd   :  { %741 = vmatpush.bf16.msrb.mxu2 %v1101_v59  ;;  %v1126_v59 = vld [vmem:[#allocation10 + $0x168] sm:$0xf0] }
  0xbe   :  { %v1129_v62 = vor.u32 %v1255_v57, %v1126_v59  ;;  %v1022_v57 = vld [vmem:[#allocation10 + $0x98] sm:$0xf0]  ;;  %v1245_v59 = vld [vmem:[#allocation10 + $0x114] sm:$0xf] }
  0xc1   :  { %742 = vmatpush.bf16.msrb.mxu2 %v1093_v7 }
  0xc5   :  { %743 = vmatpush.bf16.msrb.mxu2 %v1085_v19  ;;  %v1174_v19 = vld [vmem:[#allocation10 + $0x1c8] sm:$0xf0] }
 0x127   :  { %v249_v26 = vpop.xlane.xlu0 %248 }
 0x128   :  { %v257_v27 = vmul.f32 %v1557_v25, %v249_v26  ;;  %v1012_v26 = vld [vmem:[#allocation10 + $0x80] sm:$0xf] }
 0x12a   :  { %v1561_v28 = vsub.f32 %v1545_v32, %v257_v27  ;;  %v1564_v29 = vsub.f32 %v1547_v33, %v257_v27  ;;  %v1567_v30 = vsub.f32 %v1551_v38, %v257_v27  ;;  %v1570_v31 = vsub.f32 %v1553_v41, %v257_v27  ;;  %v980_v38 = vld [vmem:[#allocation10 + $0x40] sm:$0xf] }
 0x12b   :  { %v1044_v41 = vld [vmem:[#allocation10 + $0xc0] sm:$0xf]  ;;  %v981_v42 = vor.u32 %v1220_v40, %v980_v38  ;;  %v949_v27 = vor.u32 %v1212_v24, %v948_v23  ;;  %v1225_v38 = vld [vmem:[#allocation10 + $0x74] sm:$0xf] }
 0x12c   :  { %v262_v34 = vmul.f32 %v1561_v28, %v1561_v28  ;;  %v263_v35 = vmul.f32 %v1564_v29, %v1564_v29  ;;  %v264_v36 = vmul.f32 %v1567_v30, %v1567_v30  ;;  %v265_v33 = vmul.f32 %v1570_v31, %v1570_v31 }
 0x12d   :  { %v1045_v46 = vor.u32 %v1236_v43, %v1044_v41  ;;  %714 = vmatpush.bf16.msrb.mxu0 %v981_v42  ;;  %v1006_v41 = vld [vmem:[#allocation10 + $0x78] sm:$0xf0]  ;;  %v1241_v42 = vld [vmem:[#allocation10 + $0xf4] sm:$0xf] }
 0x12e   :  { %v266_v32 = vadd.f32 %v263_v35, %v262_v34  ;;  %v1228_v34 = vld [vmem:[#allocation10 + $0x84] sm:$0xf0]  ;;  %v1076_v35 = vld [vmem:[#allocation10 + $0x100] sm:$0xf]  ;;  %v1070_v43 = vld [vmem:[#allocation10 + $0xf8] sm:$0xf0]  ;;  %v1009_v44 = vor.u32 %v1225_v38, %v1006_v41 }
 0x12f   :  { %727 = vmatpush.bf16.msrb.mxu1 %v1045_v46  ;;  %v1073_v45 = vor.u32 %v1241_v42, %v1070_v43  ;;  %v1257_v46 = vld [vmem:[#allocation10 + $0x174] sm:$0xf]  ;;  %v1166_v41 = vld [vmem:[#allocation10 + $0x1b8] sm:$0xf0]  ;;  %v1215_v42 = vld [vmem:[#allocation10 + $0x24] sm:$0xf] }
 0x130   :  { %v267_v37 = vadd.f32 %v266_v32, %v264_v36  ;;  %v1244_v36 = vld [vmem:[#allocation10 + $0x104] sm:$0xf0]  ;;  %v1013_v32 = vor.u32 %v1228_v34, %v1012_v26  ;;  %v1137_v49 = vor.u32 %v1257_v46, %v1134_v47  ;;  %v1217_v26 = vld [vmem:[#allocation10 + $0x34] sm:$0xf]  ;;  %v1231_v46 = vld [vmem:[#allocation10 + $0xa4] sm:$0xf] }
 0x131   :  { %715 = vmatpush.bf16.msrb.mxu0 %v973_v54  ;;  %v1001_v54 = vor.u32 %v1223_v51, %v998_v52  ;;  %v1233_v34 = vld [vmem:[#allocation10 + $0xb4] sm:$0xf]  ;;  %v1030_v47 = vld [vmem:[#allocation10 + $0xa8] sm:$0xf0]  ;;  %v1263_v51 = vld [vmem:[#allocation10 + $0x1a4] sm:$0xf] }
 0x132   :  { %v268_v39 = vadd.f32 %v267_v37, %v265_v33  ;;  %v1077_v33 = vor.u32 %v1244_v36, %v1076_v35  ;;  %v1140_v37 = vld [vmem:[#allocation10 + $0x180] sm:$0xf]  ;;  %v1033_v50 = vor.u32 %v1231_v46, %v1030_v47  ;;  %v1158_v52 = vld [vmem:[#allocation10 + $0x1a8] sm:$0xf0] }
 0x133   :  { %728 = vmatpush.bf16.msrb.mxu1 %v1037_v58  ;;  %v1065_v58 = vor.u32 %v1239_v55, %v1062_v56  ;;  %v958_v55 = vld [vmem:[#allocation10 + $0x18] sm:$0xf0]  ;;  %v1229_v56 = vld [vmem:[#allocation10 + $0x94] sm:$0xf] }
 0x134   :  { %269 = vadd.xlane.f32.xlu0 %v268_v39  ;;  %v1260_v39 = vld [vmem:[#allocation10 + $0x184] sm:$0xf0]  ;;  %744 = vmatpush.bf16.msrb.mxu2 %v1077_v33  ;;  %v1249_v33 = vld [vmem:[#allocation10 + $0x134] sm:$0xf] }
 0x135   :  { %716 = vmatpush.bf16.msrb.mxu0 %v965_v2  ;;  %v1141_v40 = vor.u32 %v1260_v39, %v1140_v37  ;;  %v1237_v2 = vld [vmem:[#allocation10 + $0xd4] sm:$0xf]  ;;  %v1102_v37 = vld [vmem:[#allocation10 + $0x138] sm:$0xf0] }
 0x136   :  { %v1057_v7 = vor.u32 %v1237_v2, %v1054_v3  ;;  %v1105_v38 = vor.u32 %v1249_v33, %v1102_v37  ;;  %v1089_v2 = vor.u32 %v1245_v59, %v1086_v60  ;;  %v950_v3 = vld [vmem:[#allocation10 + $0x8] sm:$0xf0] }
 0x137   :  { %729 = vmatpush.bf16.msrb.mxu1 %v1029_v6  ;;  %757 = vmatpush.bf16.msrb.mxu3 %v1141_v40  ;;  %v993_v6 = vor.u32 %v1221_v0, %v990_v1  ;;  %v1265_v40 = vld [vmem:[#allocation10 + $0x1b4] sm:$0xf]  ;;  %v1025_v0 = vor.u32 %v1229_v56, %v1022_v57  ;;  %v1211_v1 = vld [vmem:[#allocation10 + $0x4] sm:$0xf] }
 0x138   :  { %789 = vmatpush.bf16.msra.mxu2 %v1137_v49 }
 0x139   :  { %717 = vmatpush.bf16.msrb.mxu0 %v957_v14  ;;  %v1046_v14 = vld [vmem:[#allocation10 + $0xc8] sm:$0xf0] }
 0x13a   :  { %v1049_v21 = vor.u32 %v1235_v13, %v1046_v14  ;;  %v953_v13 = vor.u32 %v1211_v1, %v950_v3  ;;  %v1017_v14 = vor.u32 %v1227_v4, %v1014_v5 }
 0x13b   :  { %730 = vmatpush.bf16.msrb.mxu1 %v1021_v18  ;;  %802 = vmatpush.bf16.msra.mxu3 %v1201_v53  ;;  %v1267_v18 = vld [vmem:[#allocation10 + $0x1c4] sm:$0xf]  ;;  %v1213_v53 = vld [vmem:[#allocation10 + $0x14] sm:$0xf] }
 0x13c   :  { %790 = vmatpush.bf16.msra.mxu2 %v1129_v62  ;;  %v1177_v23 = vor.u32 %v1267_v18, %v1174_v19  ;;  %v1150_v62 = vld [vmem:[#allocation10 + $0x198] sm:$0xf0]  ;;  %v243_v19 = vld [vmem:[%s1608_s3] sm:$0xf] }
 0x13d   :  { %718 = vmatpush.bf16.msrb.mxu0 %v949_v27  ;;  %v974_v27 = vld [vmem:[#allocation10 + $0x38] sm:$0xf0] }
 0x13e   :  { %v977_v36 = vor.u32 %v1217_v26, %v974_v27  ;;  %v289_v26 = vperm.slane %v243_v19, 1  ;;  %v290_v27 = vperm.slane %v243_v19, 2 }
 0x13f   :  { %731 = vmatpush.bf16.msrb.mxu1 %v1013_v32  ;;  %803 = vmatpush.bf16.msra.mxu3 %v1193_v63  ;;  %v1038_v32 = vld [vmem:[#allocation10 + $0xb8] sm:$0xf0]  ;;  %v961_v63 = vor.u32 %v1213_v53, %v958_v55 }
 0x140   :  { %791 = vmatpush.bf16.msra.mxu2 %v1121_v11  ;;  %v1041_v39 = vor.u32 %v1233_v34, %v1038_v32  ;;  %v1259_v11 = vld [vmem:[#allocation10 + $0x184] sm:$0xf]  ;;  %v291_v34 = vperm.slane %v243_v19, 3 }
 0x141   :  { %763 = vmatpush.bf16.msra.mxu0 %v1009_v44  ;;  %v1169_v44 = vor.u32 %v1265_v40, %v1166_v41  ;;  %v1145_v17 = vor.u32 %v1259_v11, %v1142_v12 }
 0x143   :  { %776 = vmatpush.bf16.msra.mxu1 %v1073_v45  ;;  %804 = vmatpush.bf16.msra.mxu3 %v1185_v15  ;;  %v966_v45 = vld [vmem:[#allocation10 + $0x28] sm:$0xf0] }
 0x144   :  { %792 = vmatpush.bf16.msra.mxu2 %v1113_v22  ;;  %v969_v49 = vor.u32 %v1215_v42, %v966_v45 }
 0x145   :  { %764 = vmatpush.bf16.msra.mxu0 %v1001_v54 }
 0x147   :  { %777 = vmatpush.bf16.msra.mxu1 %v1065_v58  ;;  %805 = vmatpush.bf16.msra.mxu3 %v1177_v23  ;;  %v1161_v58 = vor.u32 %v1263_v51, %v1158_v52  ;;  %v288_v23 = vperm.slane %v243_v19, 0 }
 0x148   :  { %793 = vmatpush.bf16.msra.mxu2 %v1105_v38 }
 0x149   :  { %765 = vmatpush.bf16.msra.mxu0 %v993_v6 }
 0x14b   :  { %778 = vmatpush.bf16.msra.mxu1 %v1057_v7  ;;  %806 = vmatpush.bf16.msra.mxu3 %v1169_v44  ;;  %v1153_v7 = vor.u32 %v1261_v61, %v1150_v62 }
 0x14d   :  { %766 = vmatpush.bf16.msra.mxu0 %v985_v20 }
 0x14f   :  { %779 = vmatpush.bf16.msra.mxu1 %v1049_v21  ;;  %807 = vmatpush.bf16.msra.mxu3 %v1161_v58  ;;  %v244_v21 = vld [vmem:[#allocation8] sm:$0xf]  ;;  %v385_v58 = vld [vmem:[%s1611_s6] sm:$0x3] }
 0x150   :  { %v303_v32 = vperm.slane %v244_v21, 2  ;;  %v304_v33 = vperm.slane %v244_v21, 3  ;;  %v387_v59 = vperm.slane %v385_v58, 0  ;;  %v388_v60 = vperm.slane %v385_v58, 1 }
 0x151   :  { %767 = vmatpush.bf16.msra.mxu0 %v977_v36  ;;  %v302_v36 = vperm.slane %v244_v21, 1 }
 0x153   :  { %780 = vmatpush.bf16.msra.mxu1 %v1041_v39  ;;  %808 = vmatpush.bf16.msra.mxu3 %v1153_v7 }
 0x155   :  { %768 = vmatpush.bf16.msra.mxu0 %v969_v49 }
 0x157   :  { %781 = vmatpush.bf16.msra.mxu1 %v1033_v50  ;;  %809 = vmatpush.bf16.msra.mxu3 %v1145_v17 }
 0x159   :  { %769 = vmatpush.bf16.msra.mxu0 %v961_v63 }
 0x15b   :  { %782 = vmatpush.bf16.msra.mxu1 %v1025_v0 }
 0x15d   :  { %770 = vmatpush.bf16.msra.mxu0 %v953_v13 }
 0x15f   :  { %783 = vmatpush.bf16.msra.mxu1 %v1017_v14 }
 0x1a7   :  { %v270_v24 = vpop.xlane.xlu0 %269 }
 0x1a8   :  { %v271_v35 = vmul.f32 %v270_v24, %v1557_v25  ;;  %v1247_v25 = vld [vmem:[#allocation10 + $0x124] sm:$0xf]  ;;  %v301_v24 = vperm.slane %v244_v21, 0 }
 0x1a9   :  { %v1097_v54 = vor.u32 %v1247_v25, %v1094_v48 }
 0x1aa   :  { %v1581_v43 = vadd.f32 1e-05, %v271_v35 }
 0x1ab   :  { %794 = vmatpush.bf16.msra.mxu2 %v1097_v54 }
 0x1ac   :  { %1290 = vrsqrt.f32 %v1581_v43  ;;  %vm279_vm3 = vweird.f32 %v1581_v43 }
 0x1af   :  { %795 = vmatpush.bf16.msra.mxu2 %v1089_v2 }
 0x1b2   :  { %v1291_v6 = vpop.eup %1290 }
 0x1b3   :  { %v274_v10 = vmul.f32 %v1291_v6, %v1581_v43  ;;  %vm280_vm2 = vweird.f32 %v1291_v6  ;;  %796 = vmatpush.bf16.msra.mxu2 %v1081_v16  ;;  %v1463_v16 = vmov 256.0  }
 0x1b4   :  { %vm281_vm4 = vmor %vm279_vm3, %vm280_vm2  ;;  %1292 = vrcp.f32 %v1463_v16 }
 0x1b5   :  { %v275_v15 = vmul.f32 %v1291_v6, %v274_v10 }
 0x1b7   :  { %v276_v18 = vmul.f32 0.5, %v275_v15 }
 0x1b9   :  { %v277_v20 = vsub.f32 1.5, %v276_v18 }
 0x1ba   :  { %v1293_v17 = vpop.eup %1292 }
 0x1bb   :  { %v278_v22 = vmul.f32 %v1291_v6, %v277_v20  ;;  %v821_v18 = vmul.f32 256.0, %v1293_v17  ;;  %vm825_vm5 = vweird.f32 %v1293_v17 }
 0x1bd   :  { %v282_v35 = vsel %vm281_vm4, %v1291_v6, %v278_v22  ;;  %v822_v19 = vsub.f32 1.0, %v821_v18 }
 0x1be   :  { %v283_v37 = vmul.f32 %v282_v35, %v1561_v28  ;;  %v284_v39 = vmul.f32 %v282_v35, %v1564_v29  ;;  %v285_v38 = vmul.f32 %v282_v35, %v1567_v30  ;;  %v286_v40 = vmul.f32 %v282_v35, %v1570_v31 }
 0x1bf   :  { %v823_v20 = vmul.f32 %v1293_v17, %v822_v19 }
 0x1c0   :  { %v296_v41 = vmul.f32 %v288_v23, %v283_v37  ;;  %v297_v42 = vmul.f32 %v289_v26, %v284_v39  ;;  %v298_v43 = vmul.f32 %v290_v27, %v285_v38  ;;  %v299_v44 = vmul.f32 %v291_v34, %v286_v40 }
 0x1c1   :  { %v824_v21 = vadd.f32 %v1293_v17, %v823_v20 }
 0x1c2   :  { %v309_v45 = vadd.f32 %v301_v24, %v296_v41  ;;  %v310_v46 = vadd.f32 %v302_v36, %v297_v42  ;;  %v311_v47 = vadd.f32 %v303_v32, %v298_v43  ;;  %v312_v25 = vadd.f32 %v304_v33, %v299_v44  ;;  %v815_v43 = vld [vmem:[%s1612_s7] sm:$0x3] }
 0x1c3   :  { %v826_v22 = vsel %vm825_vm5, %v1293_v17, %v824_v21 }
 0x1c4   :  { %v313_v48 = vmax.f32 %v309_v45, 0.0  ;;  %v314_v49 = vmax.f32 %v310_v46, 0.0  ;;  %v315_v50 = vmax.f32 %v311_v47, 0.0  ;;  %v316_v51 = vmax.f32 %v312_v25, 0.0  ;;  %v816_v45 = vld [vmem:[#allocation11] sm:$0x3] }
 0x1c5   :  { %v850_v46 = vperm.slane %v815_v43, 0  ;;  %v851_v47 = vperm.slane %v815_v43, 1 }
 0x1c6   :  { %v317_v52 = vpack.c.bf16 %v313_v48, %v313_v48  ;;  %v318_v28 = vpack.c.bf16 %v314_v49, %v314_v49  ;;  %v319_v53 = vpack.c.bf16 %v315_v50, %v315_v50  ;;  %v320_v29 = vpack.c.bf16 %v316_v51, %v316_v51 }
 0x1c7   :  { %v857_v50 = vperm.slane %v816_v45, 0  ;;  %v858_v51 = vperm.slane %v816_v45, 1 }
 0x1c8   :  { %719 = vmatmul.bf16.vlgmr.msrb.gmra.mxu0 %v317_v52  ;;  %732 = vmatmul.bf16.vlgmr.msrb.gmra.mxu1 %v318_v28 }
 0x1c9   :  { %745 = vmatmul.bf16.vlgmr.msrb.gmra.mxu2 %v319_v53  ;;  %758 = vmatmul.bf16.vlgmr.msrb.gmra.mxu3 %v320_v29 }
 0x1d8   :  { %771 = vmatmul.bf16.vlgmr.msra.gmra.mxu0 %v317_v52  ;;  %784 = vmatmul.bf16.vlgmr.msra.gmra.mxu1 %v318_v28  ;;  %v865_v52 = vld [vmem:[%s1614_s9] sm:$0x3] }
 0x1d9   :  { %797 = vmatmul.bf16.vlgmr.msra.gmra.mxu2 %v319_v53  ;;  %810 = vmatmul.bf16.vlgmr.msra.gmra.mxu3 %v320_v29 }
 0x245   :  { %v720_v30 = vpop.f32.mrf.mxu0  ;;  %v733_v31 = vpop.f32.mrf.mxu1 }
 0x246   :  { %v721_v63 = vadd.f32 %v720_v30, %v387_v59 }
 0x248   :  { %v734_v3 = vadd.f32 %v733_v31, %v721_v63  ;;  %v867_v31 = vperm.slane %v865_v52, 0 }
 0x24c   :  { %v746_v54 = vpop.f32.mrf.mxu2  ;;  %v759_v55 = vpop.f32.mrf.mxu3 }
 0x24d   :  { %v722_v56 = vpop.f32.mrf.mxu0  ;;  %v735_v57 = vpop.f32.mrf.mxu1  ;;  %v747_v4 = vadd.f32 %v746_v54, %v734_v3  ;;  %v868_v54 = vperm.slane %v865_v52, 1 }
 0x24f   :  { %v760_v11 = vadd.f32 %v759_v55, %v747_v4 }
 0x254   :  { %v748_v61 = vpop.f32.mrf.mxu2  ;;  %v761_v62 = vpop.f32.mrf.mxu3 }
 0x255   :  { %v772_v0 = vpop.f32.mrf.mxu0  ;;  %v785_v1 = vpop.f32.mrf.mxu1 }
 0x256   :  { %v773_v2 = vadd.f32 %v772_v0, %v388_v60  ;;  %v1287_v60 = vld [vmem:[#allocation2] ss:$0 sm:$0xff] }
 0x258   :  { %v786_v5 = vadd.f32 %v785_v1, %v773_v2 }
 0x25c   :  { %v798_v6 = vpop.f32.mrf.mxu2  ;;  %v811_v7 = vpop.f32.mrf.mxu3 }
 0x25d   :  { %v799_v8 = vadd.f32 %v798_v6, %v786_v5  ;;  %v774_v9 = vpop.f32.mrf.mxu0  ;;  %v787_v10 = vpop.f32.mrf.mxu1 }
 0x25f   :  { %v812_v12 = vadd.f32 %v811_v7, %v799_v8 }
 0x261   :  { %v817_v13 = vadd.f32 %v812_v12, %v760_v11 }
 0x263   :  { %818 = vadd.xlane.f32.xlu1 %v817_v13 }
 0x264   :  { %v800_v14 = vpop.f32.mrf.mxu2  ;;  %v813_v15 = vpop.f32.mrf.mxu3 }
 0x2d6   :  { %v819_v23 = vpop.xlane.xlu1 %818 }
 0x2d7   :  { %v827_v24 = vmul.f32 %v826_v22, %v819_v23 }
 0x2d9   :  { %v828_v26 = vsub.f32 %v760_v11, %v827_v24  ;;  %v829_v27 = vsub.f32 %v812_v12, %v827_v24 }
 0x2db   :  { %v830_v34 = vmul.f32 %v828_v26, %v828_v26  ;;  %v831_v35 = vmul.f32 %v829_v27, %v829_v27 }
 0x2dd   :  { %v832_v36 = vadd.f32 %v831_v35, %v830_v34 }
 0x2df   :  { %833 = vadd.xlane.f32.xlu1 %v832_v36 }
 0x352   :  { %v834_v32 = vpop.xlane.xlu1 %833 }
 0x353   :  { %v835_v33 = vmul.f32 %v834_v32, %v826_v22 }
 0x355   :  { %v836_v37 = vadd.f32 1e-05, %v835_v33 }
 0x357   :  { %1294 = vrsqrt.f32 %v836_v37  ;;  %vm843_vm7 = vweird.f32 %v836_v37 }
 0x35d   :  { %v1295_v39 = vpop.eup %1294 }
 0x35e   :  { %v838_v38 = vmul.f32 %v1295_v39, %v836_v37  ;;  %vm844_vm6 = vweird.f32 %v1295_v39 }
 0x35f   :  { %vm845_vm8 = vmor %vm843_vm7, %vm844_vm6 }
 0x360   :  { %v839_v40 = vmul.f32 %v1295_v39, %v838_v38 }
 0x362   :  { %v840_v41 = vmul.f32 0.5, %v839_v40 }
 0x364   :  { %v841_v42 = vsub.f32 1.5, %v840_v41 }
 0x366   :  { %v842_v44 = vmul.f32 %v1295_v39, %v841_v42 }
 0x368   :  { %v846_v25 = vsel %vm845_vm8, %v1295_v39, %v842_v44 }
 0x369   :  { %v847_v48 = vmul.f32 %v846_v25, %v828_v26  ;;  %v848_v49 = vmul.f32 %v846_v25, %v829_v27 }
 0x36b   :  { %v854_v28 = vmul.f32 %v850_v46, %v847_v48  ;;  %v855_v53 = vmul.f32 %v851_v47, %v848_v49 }
 0x36d   :  { %v861_v29 = vadd.f32 %v857_v50, %v854_v28  ;;  %v862_v30 = vadd.f32 %v858_v51, %v855_v53 }
 0x36f   :  { %v863_v55 = vmax.f32 %v861_v29, 0.0  ;;  %v864_v56 = vmax.f32 %v862_v30, 0.0 }
 0x371   :  { %v871_v57 = vmul.f32 %v867_v31, %v863_v55  ;;  %v872_v58 = vmul.f32 %v868_v54, %v864_v56 }
 0x373   :  { %v873_v59 = vadd.f32 %v872_v58, %v871_v57 }
 0x375   :  { %874 = vadd.xlane.f32.xlu2 %v873_v59 }
 0x3e8   :  { %v875_v61 = vpop.xlane.xlu2 %874 }
 0x3e9   :  { %v880_v62 = vadd.f32 %v1287_v60, %v875_v61 }
 0x3eb   :  { %v1202_v63 = vmul.f32 -1.442695, %v880_v62 }
 0x3ed   :  { %1296 = vpow2.f32 %v1202_v63 }
 0x3f3   :  { %v1297_v0 = vpop.eup %1296 }
 0x3f4   :  { %v884_v1 = vadd.f32 1.0, %v1297_v0 }
 0x3f6   :  { %1298 = vrcp.f32 %v884_v1  ;;  %v896_v5 = vand.u32 2147483648, %v884_v1  ;;  %v894_v7 = vand.u32 2147483647, %v884_v1  ;;  %vm890_vm10 = vweird.f32 %v884_v1 }
 0x3f8   :  { %v897_v9 = vor.u32 1.1754944e-38, %v896_v5  ;;  %vm895_vm13 = vcmp.eq.f32.partialorder %v894_v7, 8.507059e+37 }
 0x3fc   :  { %v1299_v2 = vpop.eup %1298 }
 0x3fd   :  { %v886_v3 = vmul.f32 %v1299_v2, %v884_v1  ;;  %vm891_vm9 = vweird.f32 %v1299_v2 }
 0x3fe   :  { %vm892_vm12 = vmor %vm890_vm10, %vm891_vm9 }
 0x3ff   :  { %v887_v4 = vsub.f32 1.0, %v886_v3 }
 0x401   :  { %v888_v6 = vmul.f32 %v1299_v2, %v887_v4 }
 0x403   :  { %v889_v8 = vadd.f32 %v1299_v2, %v888_v6 }
 0x405   :  { %v893_v10 = vsel %vm892_vm12, %v1299_v2, %v889_v8 }
 0x406   :  { %v898_v11 = vsel %vm895_vm13, %v897_v9, %v893_v10 }
 0x407   :  { %901 = vst.msk [vmem:[%s1616_s11] sm:$0xff] %vm900_vm11, %v898_v11 }
 0x408   :  { %906 = vsyncpa [#allocation4], 1 }
 0x409   :  { %907 = vsyncpa [#allocation6], 1 }
 0x40a   :  { %908 = vsyncpa [#allocation9], 1 }
 0x40b   :  { %909 = vsyncpa [#allocation12], 1 }

</bundles_post_ra>
